<compile_context>
chip_gen: v6e
topology: v6e:2x2x1
jax: 0.10.0
libtpu: 0.0.40
codegen_flags: <defaults>
</compile_context>

<pallas_src>
import functools
import math

import jax
import jax.numpy as jnp
from jax import lax
from jax.experimental import pallas as pl
from jax.experimental.pallas import tpu as pltpu

# Explicit VMEM cap: <= half of v7x's 64 MiB physical VMEM; also fine on v5e/v6e.
_VMEM_LIMIT_BYTES = 32 * 1024 * 1024

# Tile targets: 256-aligned for v6e/v7x's 256-wide MXU (also 128-multiples for v5e).
_Q_TILE = 256
_KV_TILE = 512
_PROJ_S_TILE = 256


def _pick_tile(dim: int, target: int) -> int:
    """Largest t <= target that divides dim and is a multiple of 8 (or t == dim)."""
    t = min(dim, target)
    while t > 1:
        if dim % t == 0 and (t % 8 == 0 or t == dim):
            return t
        t -= 1
    return dim


# ----------------------------------------------------------------------------
# Kernel 1: fused QKV projection (per batch, per head, per sequence tile)
# ----------------------------------------------------------------------------
def _qkv_proj_kernel(x_ref, w_ref, q_ref, k_ref, v_ref, *, scale):
    # x_ref: (1, ts, E)   w_ref: (3, 1, D, E)   q/k/v_ref: (1, 1, ts, D)
    x = x_ref[0]                                   # (ts, E)
    dn = (((1,), (1,)), ((), ()))                  # contract last dims: x @ w_h^T
    q = lax.dot_general(x, w_ref[0, 0], dn, preferred_element_type=jnp.float32)
    k = lax.dot_general(x, w_ref[1, 0], dn, preferred_element_type=jnp.float32)
    v = lax.dot_general(x, w_ref[2, 0], dn, preferred_element_type=jnp.float32)
    # Fold 1/sqrt(embed_dim) into q once (S*D elements, not S*S scores).
    q_ref[0, 0] = (q * scale).astype(q_ref.dtype)
    k_ref[0, 0] = k.astype(k_ref.dtype)
    v_ref[0, 0] = v.astype(v_ref.dtype)


def _qkv_projection(x, w, s_tile, scale):
    B, S, E = x.shape
    _, H, D, _ = w.shape
    n_s = S // s_tile
    out = jax.ShapeDtypeStruct((B, H, S, D), x.dtype)
    itemsize = jnp.dtype(x.dtype).itemsize
    cost = pl.CostEstimate(
        flops=2 * B * S * E * 3 * E,
        transcendentals=0,
        bytes_accessed=(B * S * E + 3 * E * E + 3 * B * S * E) * itemsize,
    )
    kernel = functools.partial(_qkv_proj_kernel, scale=scale)
    return pl.pallas_call(
        kernel,
        out_shape=(out, out, out),
        grid_spec=pltpu.PrefetchScalarGridSpec(
            num_scalar_prefetch=0,
            # seq-tile axis innermost -> weight slab stays resident across it.
            grid=(B, H, n_s),
            in_specs=[
                pl.BlockSpec((1, s_tile, E), lambda b, h, s: (b, s, 0)),
                pl.BlockSpec((3, 1, D, E), lambda b, h, s: (0, h, 0, 0)),
            ],
            out_specs=[
                pl.BlockSpec((1, 1, s_tile, D), lambda b, h, s: (b, h, s, 0)),
                pl.BlockSpec((1, 1, s_tile, D), lambda b, h, s: (b, h, s, 0)),
                pl.BlockSpec((1, 1, s_tile, D), lambda b, h, s: (b, h, s, 0)),
            ],
        ),
        compiler_params=pltpu.CompilerParams(
            dimension_semantics=("parallel", "parallel", "parallel"),
            vmem_limit_bytes=_VMEM_LIMIT_BYTES,
        ),
        cost_estimate=cost,
    )(x, w)


# ----------------------------------------------------------------------------
# Kernel 2: flash attention with online softmax (per batch, head, Q tile; KV loop)
# ----------------------------------------------------------------------------
def _flash_attn_kernel(q_ref, k_ref, v_ref, o_ref, m_sc, l_sc, acc_sc):
    ki = pl.program_id(3)

    @pl.when(ki == 0)
    def _():
        m_sc[...] = jnp.full(m_sc.shape, -jnp.inf, dtype=m_sc.dtype)
        l_sc[...] = jnp.zeros(l_sc.shape, dtype=l_sc.dtype)
        acc_sc[...] = jnp.zeros(acc_sc.shape, dtype=acc_sc.dtype)

    q = q_ref[0, 0]     # (tq, D)  -- already scaled by 1/sqrt(E)
    k = k_ref[0, 0]     # (tkv, D)
    v = v_ref[0, 0]     # (tkv, D)

    # q @ k^T without materializing a transposed K tile (contract last dims).
    s = lax.dot_general(q, k, (((1,), (1,)), ((), ())),
                        preferred_element_type=jnp.float32)        # (tq, tkv)

    m_prev = m_sc[...]
    m_next = jnp.maximum(m_prev, jnp.max(s, axis=-1, keepdims=True))
    alpha = jnp.exp(m_prev - m_next)
    p = jnp.exp(s - m_next)
    l_sc[...] = alpha * l_sc[...] + jnp.sum(p, axis=-1, keepdims=True)
    acc_sc[...] = alpha * acc_sc[...] + jnp.dot(
        p.astype(v.dtype), v, preferred_element_type=jnp.float32)
    m_sc[...] = m_next

    @pl.when(ki == pl.num_programs(3) - 1)
    def _():
        inv_l = pl.reciprocal(l_sc[...], approx=True)   # EUP, finalize-only
        o_ref[0, 0] = (acc_sc[...] * inv_l).astype(o_ref.dtype)


def _flash_attention(q, k, v, q_tile, kv_tile):
    B, H, S, D = q.shape
    n_q, n_kv = S // q_tile, S // kv_tile
    itemsize = jnp.dtype(q.dtype).itemsize
    cost = pl.CostEstimate(
        flops=4 * B * H * S * S * D,
        transcendentals=B * H * S * S,
        bytes_accessed=4 * B * H * S * D * itemsize,
    )
    return pl.pallas_call(
        _flash_attn_kernel,
        out_shape=jax.ShapeDtypeStruct((B, H, S, D), q.dtype),
        grid_spec=pltpu.PrefetchScalarGridSpec(
            num_scalar_prefetch=0,
            grid=(B, H, n_q, n_kv),     # KV (reduction) innermost
            in_specs=[
                pl.BlockSpec((1, 1, q_tile, D), lambda b, h, qi, ki: (b, h, qi, 0)),
                pl.BlockSpec((1, 1, kv_tile, D), lambda b, h, qi, ki: (b, h, ki, 0)),
                pl.BlockSpec((1, 1, kv_tile, D), lambda b, h, qi, ki: (b, h, ki, 0)),
            ],
            out_specs=pl.BlockSpec((1, 1, q_tile, D),
                                   lambda b, h, qi, ki: (b, h, qi, 0)),
            scratch_shapes=[
                pltpu.VMEM((q_tile, 1), jnp.float32),   # running max m
                pltpu.VMEM((q_tile, 1), jnp.float32),   # running denom l
                pltpu.VMEM((q_tile, D), jnp.float32),   # output accumulator
            ],
        ),
        compiler_params=pltpu.CompilerParams(
            dimension_semantics=("parallel", "parallel", "parallel", "arbitrary"),
            vmem_limit_bytes=_VMEM_LIMIT_BYTES,
        ),
        cost_estimate=cost,
    )(q, k, v)


# ----------------------------------------------------------------------------
# Wrapper matching the PyTorch module's forward
# ----------------------------------------------------------------------------
def multi_head_attention(hidden_states, weight, num_heads):
    """hidden_states: (B, S, E); weight: (3E, E) as in nn.Linear(E, 3E, bias=False)."""
    B, S, E = hidden_states.shape
    assert weight.shape == (3 * E, E)
    assert E % num_heads == 0
    D = E // num_heads
    # (3E, E) -> (3, H, D, E): pure row split of the fused weight, no transpose.
    w = weight.reshape(3, num_heads, D, E)
    scale = 1.0 / math.sqrt(E)   # module scales by 1/sqrt(embed_dim)

    s_tile = _pick_tile(S, _PROJ_S_TILE)
    q_tile = _pick_tile(S, _Q_TILE)
    kv_tile = _pick_tile(S, _KV_TILE)

    q, k, v = _qkv_projection(hidden_states, w, s_tile, scale)   # (B, H, S, D) each
    o = _flash_attention(q, k, v, q_tile, kv_tile)               # (B, H, S, D)
    # merge_heads: 'b h s d -> b s (h d)'
    return jnp.transpose(o, (0, 2, 1, 3)).reshape(B, S, E)


def multi_head_attention_ref(hidden_states, weight, num_heads):
    """Pure-JAX reference matching the PyTorch MultiHeadedAttention forward."""
    B, S, E = hidden_states.shape
    D = E // num_heads
    qkv = hidden_states @ weight.T
    q, k, v = jnp.split(qkv, 3, axis=-1)

    def split_heads(t):
        return jnp.transpose(t.reshape(B, S, num_heads, D), (0, 2, 1, 3))

    q, k, v = split_heads(q), split_heads(k), split_heads(v)
    s = jnp.einsum("bhqd,bhkd->bhqk", q, k) * (1.0 / math.sqrt(E))
    w = jax.nn.softmax(s, axis=-1)
    o = jnp.einsum("bhqk,bhkd->bhqd", w, v)
    return jnp.transpose(o, (0, 2, 1, 3)).reshape(B, S, E)


if __name__ == "__main__":
    # Small deterministic example: batch=2, seq=8, embed=32, heads=4 (head_dim=8)
    B, S, E, H = 2, 8, 32, 4
    key = jax.random.PRNGKey(0)
    kx, kw = jax.random.split(key)
    hidden_states = jax.random.normal(kx, (B, S, E), dtype=jnp.float32)
    # nn.Linear(embed_dim, 3*embed_dim, bias=False).weight has shape (3E, E)
    weight = jax.random.normal(kw, (3 * E, E), dtype=jnp.float32) * (1.0 / math.sqrt(E))

    mha = jax.jit(multi_head_attention, static_argnums=(2,))
    out = jax.block_until_ready(mha(hidden_states, weight, H))

    ref = multi_head_attention_ref(hidden_states, weight, H)
    assert out.shape == (B, S, E)
    max_err = float(jnp.max(jnp.abs(out - ref)))
    assert jnp.allclose(out, ref, atol=2e-3, rtol=2e-3), (
        f"mismatch vs reference: max_abs_err={max_err}")

    print("KERNEL_OK")
</pallas_src>

<mosaic_0001>
module attributes {stable_mosaic.version = 11 : i64} {
  func.func @_qkv_proj_kernel(%arg0: i32, %arg1: i32, %arg2: i32, %arg3: memref<1x8x32xf32, #tpu.memory_space<vmem>>, %arg4: memref<3x1x8x32xf32, #tpu.memory_space<vmem>>, %arg5: memref<1x1x8x8xf32, #tpu.memory_space<vmem>>, %arg6: memref<1x1x8x8xf32, #tpu.memory_space<vmem>>, %arg7: memref<1x1x8x8xf32, #tpu.memory_space<vmem>>) attributes {dimension_semantics = [#tpu.dimension_semantics<parallel>, #tpu.dimension_semantics<parallel>, #tpu.dimension_semantics<parallel>], iteration_bounds = array<i64: 2, 4, 1>, scalar_prefetch = 0 : i64, scratch_operands = 0 : i64, tpu.core_type = #tpu.core_type<tc>, window_params = [{transform_indices = @transform_0, window_bounds = array<i64: 1, 8, 32>}, {transform_indices = @transform_1, window_bounds = array<i64: 3, 1, 8, 32>}, {transform_indices = @transform_2, window_bounds = array<i64: 1, 1, 8, 8>}, {transform_indices = @transform_3, window_bounds = array<i64: 1, 1, 8, 8>}, {transform_indices = @transform_4, window_bounds = array<i64: 1, 1, 8, 8>}]} {
    %c0 = arith.constant 0 : index
    %c0_0 = arith.constant 0 : index
    %c0_1 = arith.constant 0 : index
    %0 = vector.load %arg3[%c0, %c0_0, %c0_1] : memref<1x8x32xf32, #tpu.memory_space<vmem>>, vector<1x8x32xf32>
    %1 = vector.shape_cast %0 : vector<1x8x32xf32> to vector<8x32xf32>
    %c0_2 = arith.constant 0 : index
    %c0_3 = arith.constant 0 : index
    %c0_4 = arith.constant 0 : index
    %c0_5 = arith.constant 0 : index
    %2 = vector.load %arg4[%c0_2, %c0_3, %c0_4, %c0_5] : memref<3x1x8x32xf32, #tpu.memory_space<vmem>>, vector<1x1x8x32xf32>
    %3 = vector.shape_cast %2 : vector<1x1x8x32xf32> to vector<8x32xf32>
    %cst = arith.constant dense<0.000000e+00> : vector<8x8xf32>
    %4 = tpu.matmul %1, %3, %cst {dimension_numbers = #tpu.dot_dimension_numbers<[1], [1], [0], [0], [0, 0, 1, 0], [], []>} : vector<8x32xf32>, vector<8x32xf32>, vector<8x8xf32> -> vector<8x8xf32>
    %c1 = arith.constant 1 : index
    %c0_6 = arith.constant 0 : index
    %c0_7 = arith.constant 0 : index
    %c0_8 = arith.constant 0 : index
    %5 = vector.load %arg4[%c1, %c0_6, %c0_7, %c0_8] : memref<3x1x8x32xf32, #tpu.memory_space<vmem>>, vector<1x1x8x32xf32>
    %6 = vector.shape_cast %5 : vector<1x1x8x32xf32> to vector<8x32xf32>
    %cst_9 = arith.constant dense<0.000000e+00> : vector<8x8xf32>
    %7 = tpu.matmul %1, %6, %cst_9 {dimension_numbers = #tpu.dot_dimension_numbers<[1], [1], [0], [0], [0, 0, 1, 0], [], []>} : vector<8x32xf32>, vector<8x32xf32>, vector<8x8xf32> -> vector<8x8xf32>
    %c2 = arith.constant 2 : index
    %c0_10 = arith.constant 0 : index
    %c0_11 = arith.constant 0 : index
    %c0_12 = arith.constant 0 : index
    %8 = vector.load %arg4[%c2, %c0_10, %c0_11, %c0_12] : memref<3x1x8x32xf32, #tpu.memory_space<vmem>>, vector<1x1x8x32xf32>
    %9 = vector.shape_cast %8 : vector<1x1x8x32xf32> to vector<8x32xf32>
    %cst_13 = arith.constant dense<0.000000e+00> : vector<8x8xf32>
    %10 = tpu.matmul %1, %9, %cst_13 {dimension_numbers = #tpu.dot_dimension_numbers<[1], [1], [0], [0], [0, 0, 1, 0], [], []>} : vector<8x32xf32>, vector<8x32xf32>, vector<8x8xf32> -> vector<8x8xf32>
    %cst_14 = arith.constant 0.176776692 : f32
    %11 = vector.broadcast %cst_14 : f32 to vector<8x8xf32>
    %12 = arith.mulf %4, %11 : vector<8x8xf32>
    %c0_15 = arith.constant 0 : index
    %c0_16 = arith.constant 0 : index
    %c0_17 = arith.constant 0 : index
    %c0_18 = arith.constant 0 : index
    %13 = vector.load %arg5[%c0_15, %c0_16, %c0_17, %c0_18] : memref<1x1x8x8xf32, #tpu.memory_space<vmem>>, vector<1x1x8x8xf32>
    %14 = vector.shape_cast %13 : vector<1x1x8x8xf32> to vector<8x8xf32>
    %15 = vector.shape_cast %12 : vector<8x8xf32> to vector<1x1x8x8xf32>
    tpu.vector_store %arg5[%c0_15, %c0_16, %c0_17, %c0_18], %15 {strides = array<i32>} : memref<1x1x8x8xf32, #tpu.memory_space<vmem>>, vector<1x1x8x8xf32>,
    %c0_19 = arith.constant 0 : index
    %c0_20 = arith.constant 0 : index
    %c0_21 = arith.constant 0 : index
    %c0_22 = arith.constant 0 : index
    %16 = vector.load %arg6[%c0_19, %c0_20, %c0_21, %c0_22] : memref<1x1x8x8xf32, #tpu.memory_space<vmem>>, vector<1x1x8x8xf32>
    %17 = vector.shape_cast %16 : vector<1x1x8x8xf32> to vector<8x8xf32>
    %18 = vector.shape_cast %7 : vector<8x8xf32> to vector<1x1x8x8xf32>
    tpu.vector_store %arg6[%c0_19, %c0_20, %c0_21, %c0_22], %18 {strides = array<i32>} : memref<1x1x8x8xf32, #tpu.memory_space<vmem>>, vector<1x1x8x8xf32>,
    %c0_23 = arith.constant 0 : index
    %c0_24 = arith.constant 0 : index
    %c0_25 = arith.constant 0 : index
    %c0_26 = arith.constant 0 : index
    %19 = vector.load %arg7[%c0_23, %c0_24, %c0_25, %c0_26] : memref<1x1x8x8xf32, #tpu.memory_space<vmem>>, vector<1x1x8x8xf32>
    %20 = vector.shape_cast %19 : vector<1x1x8x8xf32> to vector<8x8xf32>
    %21 = vector.shape_cast %10 : vector<8x8xf32> to vector<1x1x8x8xf32>
    tpu.vector_store %arg7[%c0_23, %c0_24, %c0_25, %c0_26], %21 {strides = array<i32>} : memref<1x1x8x8xf32, #tpu.memory_space<vmem>>, vector<1x1x8x8xf32>,
    return
  }
  func.func @transform_0(%arg0: i32, %arg1: i32, %arg2: i32) -> (i32, i32, i32) {
    %c0_i32 = arith.constant 0 : i32
    %c0_i32_0 = arith.constant 0 : i32
    return %arg0, %arg2, %c0_i32 : i32, i32, i32
  }
  func.func @transform_1(%arg0: i32, %arg1: i32, %arg2: i32) -> (i32, i32, i32, i32) {
    %c0_i32 = arith.constant 0 : i32
    %c0_i32_0 = arith.constant 0 : i32
    %c0_i32_1 = arith.constant 0 : i32
    %c0_i32_2 = arith.constant 0 : i32
    return %c0_i32, %arg1, %c0_i32_0, %c0_i32_1 : i32, i32, i32, i32
  }
  func.func @transform_2(%arg0: i32, %arg1: i32, %arg2: i32) -> (i32, i32, i32, i32) {
    %c0_i32 = arith.constant 0 : i32
    %c0_i32_0 = arith.constant 0 : i32
    return %arg0, %arg1, %arg2, %c0_i32 : i32, i32, i32, i32
  }
  func.func @transform_3(%arg0: i32, %arg1: i32, %arg2: i32) -> (i32, i32, i32, i32) {
    %c0_i32 = arith.constant 0 : i32
    %c0_i32_0 = arith.constant 0 : i32
    return %arg0, %arg1, %arg2, %c0_i32 : i32, i32, i32, i32
  }
  func.func @transform_4(%arg0: i32, %arg1: i32, %arg2: i32) -> (i32, i32, i32, i32) {
    %c0_i32 = arith.constant 0 : i32
    %c0_i32_0 = arith.constant 0 : i32
    return %arg0, %arg1, %arg2, %c0_i32 : i32, i32, i32, i32
  }
}

module attributes {stable_mosaic.version = 11 : i64} {
  func.func @_flash_attn_kernel(%arg0: i32, %arg1: i32, %arg2: i32, %arg3: i32, %arg4: memref<1x1x8x8xf32, #tpu.memory_space<vmem>>, %arg5: memref<1x1x8x8xf32, #tpu.memory_space<vmem>>, %arg6: memref<1x1x8x8xf32, #tpu.memory_space<vmem>>, %arg7: memref<1x1x8x8xf32, #tpu.memory_space<vmem>>, %arg8: memref<8x1xf32, #tpu.memory_space<vmem>>, %arg9: memref<8x1xf32, #tpu.memory_space<vmem>>, %arg10: memref<8x8xf32, #tpu.memory_space<vmem>>) attributes {dimension_semantics = [#tpu.dimension_semantics<parallel>, #tpu.dimension_semantics<parallel>, #tpu.dimension_semantics<parallel>, #tpu.dimension_semantics<arbitrary>], iteration_bounds = array<i64: 2, 4, 1, 1>, scalar_prefetch = 0 : i64, scratch_operands = 3 : i64, tpu.core_type = #tpu.core_type<tc>, window_params = [{transform_indices = @transform_0, window_bounds = array<i64: 1, 1, 8, 8>}, {transform_indices = @transform_1, window_bounds = array<i64: 1, 1, 8, 8>}, {transform_indices = @transform_2, window_bounds = array<i64: 1, 1, 8, 8>}, {transform_indices = @transform_3, window_bounds = array<i64: 1, 1, 8, 8>}]} {
    %c0_i32 = arith.constant 0 : i32
    %0 = arith.cmpi eq, %arg3, %c0_i32 : i32
    %1 = arith.extui %0 : i1 to i32
    %c0_i32_0 = arith.constant 0 : i32
    %2 = arith.cmpi ne, %1, %c0_i32_0 : i32
    scf.if %2 {
      %cst_29 = arith.constant 0xFF800000 : f32
      %35 = vector.broadcast %cst_29 : f32 to vector<8x1xf32>
      %c0_30 = arith.constant 0 : index
      %c0_31 = arith.constant 0 : index
      %36 = vector.load %arg8[%c0_30, %c0_31] : memref<8x1xf32, #tpu.memory_space<vmem>>, vector<8x1xf32>
      tpu.vector_store %arg8[%c0_30, %c0_31], %35 {strides = array<i32>} : memref<8x1xf32, #tpu.memory_space<vmem>>, vector<8x1xf32>,
      %cst_32 = arith.constant 0.000000e+00 : f32
      %37 = vector.broadcast %cst_32 : f32 to vector<8x1xf32>
      %c0_33 = arith.constant 0 : index
      %c0_34 = arith.constant 0 : index
      %38 = vector.load %arg9[%c0_33, %c0_34] : memref<8x1xf32, #tpu.memory_space<vmem>>, vector<8x1xf32>
      tpu.vector_store %arg9[%c0_33, %c0_34], %37 {strides = array<i32>} : memref<8x1xf32, #tpu.memory_space<vmem>>, vector<8x1xf32>,
      %cst_35 = arith.constant 0.000000e+00 : f32
      %39 = vector.broadcast %cst_35 : f32 to vector<8x8xf32>
      %c0_36 = arith.constant 0 : index
      %c0_37 = arith.constant 0 : index
      %40 = vector.load %arg10[%c0_36, %c0_37] : memref<8x8xf32, #tpu.memory_space<vmem>>, vector<8x8xf32>
      tpu.vector_store %arg10[%c0_36, %c0_37], %39 {strides = array<i32>} : memref<8x8xf32, #tpu.memory_space<vmem>>, vector<8x8xf32>,
    } else {
    }
    %c0 = arith.constant 0 : index
    %c0_1 = arith.constant 0 : index
    %c0_2 = arith.constant 0 : index
    %c0_3 = arith.constant 0 : index
    %3 = vector.load %arg4[%c0, %c0_1, %c0_2, %c0_3] : memref<1x1x8x8xf32, #tpu.memory_space<vmem>>, vector<1x1x8x8xf32>
    %4 = vector.shape_cast %3 : vector<1x1x8x8xf32> to vector<8x8xf32>
    %c0_4 = arith.constant 0 : index
    %c0_5 = arith.constant 0 : index
    %c0_6 = arith.constant 0 : index
    %c0_7 = arith.constant 0 : index
    %5 = vector.load %arg5[%c0_4, %c0_5, %c0_6, %c0_7] : memref<1x1x8x8xf32, #tpu.memory_space<vmem>>, vector<1x1x8x8xf32>
    %6 = vector.shape_cast %5 : vector<1x1x8x8xf32> to vector<8x8xf32>
    %c0_8 = arith.constant 0 : index
    %c0_9 = arith.constant 0 : index
    %c0_10 = arith.constant 0 : index
    %c0_11 = arith.constant 0 : index
    %7 = vector.load %arg6[%c0_8, %c0_9, %c0_10, %c0_11] : memref<1x1x8x8xf32, #tpu.memory_space<vmem>>, vector<1x1x8x8xf32>
    %8 = vector.shape_cast %7 : vector<1x1x8x8xf32> to vector<8x8xf32>
    %cst = arith.constant dense<0.000000e+00> : vector<8x8xf32>
    %9 = tpu.matmul %4, %6, %cst {dimension_numbers = #tpu.dot_dimension_numbers<[1], [1], [0], [0], [0, 0, 1, 0], [], []>} : vector<8x8xf32>, vector<8x8xf32>, vector<8x8xf32> -> vector<8x8xf32>
    %c0_12 = arith.constant 0 : index
    %c0_13 = arith.constant 0 : index
    %10 = vector.load %arg8[%c0_12, %c0_13] : memref<8x1xf32, #tpu.memory_space<vmem>>, vector<8x1xf32>
    %cst_14 = arith.constant dense<0xFF800000> : vector<8xf32>
    %11 = vector.multi_reduction <maximumf>, %9, %cst_14 [1] : vector<8x8xf32> to vector<8xf32>
    %12 = vector.shape_cast %11 : vector<8xf32> to vector<8x1xf32>
    %13 = arith.maximumf %10, %12 : vector<8x1xf32>
    %14 = arith.subf %10, %13 : vector<8x1xf32>
    %15 = math.exp %14 : vector<8x1xf32>
    %16 = vector.broadcast %13 : vector<8x1xf32> to vector<8x8xf32>
    %17 = arith.subf %9, %16 : vector<8x8xf32>
    %18 = math.exp %17 : vector<8x8xf32>
    %c0_15 = arith.constant 0 : index
    %c0_16 = arith.constant 0 : index
    %19 = vector.load %arg9[%c0_15, %c0_16] : memref<8x1xf32, #tpu.memory_space<vmem>>, vector<8x1xf32>
    %20 = arith.mulf %15, %19 : vector<8x1xf32>
    %cst_17 = arith.constant dense<0.000000e+00> : vector<8xf32>
    %21 = vector.multi_reduction <add>, %18, %cst_17 [1] : vector<8x8xf32> to vector<8xf32>
    %22 = vector.shape_cast %21 : vector<8xf32> to vector<8x1xf32>
    %23 = arith.addf %20, %22 : vector<8x1xf32>
    %c0_18 = arith.constant 0 : index
    %c0_19 = arith.constant 0 : index
    %24 = vector.load %arg9[%c0_18, %c0_19] : memref<8x1xf32, #tpu.memory_space<vmem>>, vector<8x1xf32>
    tpu.vector_store %arg9[%c0_18, %c0_19], %23 {strides = array<i32>} : memref<8x1xf32, #tpu.memory_space<vmem>>, vector<8x1xf32>,
    %c0_20 = arith.constant 0 : index
    %c0_21 = arith.constant 0 : index
    %25 = vector.load %arg10[%c0_20, %c0_21] : memref<8x8xf32, #tpu.memory_space<vmem>>, vector<8x8xf32>
    %26 = vector.broadcast %15 : vector<8x1xf32> to vector<8x8xf32>
    %27 = arith.mulf %26, %25 : vector<8x8xf32>
    %cst_22 = arith.constant dense<0.000000e+00> : vector<8x8xf32>
    %28 = tpu.matmul %18, %8, %cst_22 {dimension_numbers = #tpu.dot_dimension_numbers<[1], [0], [0], [1], [0, 0, 1, 1], [], []>} : vector<8x8xf32>, vector<8x8xf32>, vector<8x8xf32> -> vector<8x8xf32>
    %29 = arith.addf %27, %28 : vector<8x8xf32>
    %c0_23 = arith.constant 0 : index
    %c0_24 = arith.constant 0 : index
    %30 = vector.load %arg10[%c0_23, %c0_24] : memref<8x8xf32, #tpu.memory_space<vmem>>, vector<8x8xf32>
    tpu.vector_store %arg10[%c0_23, %c0_24], %29 {strides = array<i32>} : memref<8x8xf32, #tpu.memory_space<vmem>>, vector<8x8xf32>,
    %c0_25 = arith.constant 0 : index
    %c0_26 = arith.constant 0 : index
    %31 = vector.load %arg8[%c0_25, %c0_26] : memref<8x1xf32, #tpu.memory_space<vmem>>, vector<8x1xf32>
    tpu.vector_store %arg8[%c0_25, %c0_26], %13 {strides = array<i32>} : memref<8x1xf32, #tpu.memory_space<vmem>>, vector<8x1xf32>,
    %c0_i32_27 = arith.constant 0 : i32
    %32 = arith.cmpi eq, %arg3, %c0_i32_27 : i32
    %33 = arith.extui %32 : i1 to i32
    %c0_i32_28 = arith.constant 0 : i32
    %34 = arith.cmpi ne, %33, %c0_i32_28 : i32
    scf.if %34 {
      %c0_29 = arith.constant 0 : index
      %c0_30 = arith.constant 0 : index
      %35 = vector.load %arg9[%c0_29, %c0_30] : memref<8x1xf32, #tpu.memory_space<vmem>>, vector<8x1xf32>
      %36 = tpu.reciprocal %35 {approx = true} : vector<8x1xf32> -> vector<8x1xf32>
      %c0_31 = arith.constant 0 : index
      %c0_32 = arith.constant 0 : index
      %37 = vector.load %arg10[%c0_31, %c0_32] : memref<8x8xf32, #tpu.memory_space<vmem>>, vector<8x8xf32>
      %38 = vector.broadcast %36 : vector<8x1xf32> to vector<8x8xf32>
      %39 = arith.mulf %37, %38 : vector<8x8xf32>
      %c0_33 = arith.constant 0 : index
      %c0_34 = arith.constant 0 : index
      %c0_35 = arith.constant 0 : index
      %c0_36 = arith.constant 0 : index
      %40 = vector.load %arg7[%c0_33, %c0_34, %c0_35, %c0_36] : memref<1x1x8x8xf32, #tpu.memory_space<vmem>>, vector<1x1x8x8xf32>
      %41 = vector.shape_cast %40 : vector<1x1x8x8xf32> to vector<8x8xf32>
      %42 = vector.shape_cast %39 : vector<8x8xf32> to vector<1x1x8x8xf32>
      tpu.vector_store %arg7[%c0_33, %c0_34, %c0_35, %c0_36], %42 {strides = array<i32>} : memref<1x1x8x8xf32, #tpu.memory_space<vmem>>, vector<1x1x8x8xf32>,
    } else {
    }
    return
  }
  func.func @transform_0(%arg0: i32, %arg1: i32, %arg2: i32, %arg3: i32) -> (i32, i32, i32, i32) {
    %c0_i32 = arith.constant 0 : i32
    %c0_i32_0 = arith.constant 0 : i32
    return %arg0, %arg1, %arg2, %c0_i32 : i32, i32, i32, i32
  }
  func.func @transform_1(%arg0: i32, %arg1: i32, %arg2: i32, %arg3: i32) -> (i32, i32, i32, i32) {
    %c0_i32 = arith.constant 0 : i32
    %c0_i32_0 = arith.constant 0 : i32
    return %arg0, %arg1, %arg3, %c0_i32 : i32, i32, i32, i32
  }
  func.func @transform_2(%arg0: i32, %arg1: i32, %arg2: i32, %arg3: i32) -> (i32, i32, i32, i32) {
    %c0_i32 = arith.constant 0 : i32
    %c0_i32_0 = arith.constant 0 : i32
    return %arg0, %arg1, %arg3, %c0_i32 : i32, i32, i32, i32
  }
  func.func @transform_3(%arg0: i32, %arg1: i32, %arg2: i32, %arg3: i32) -> (i32, i32, i32, i32) {
    %c0_i32 = arith.constant 0 : i32
    %c0_i32_0 = arith.constant 0 : i32
    return %arg0, %arg1, %arg2, %c0_i32 : i32, i32, i32, i32
  }
}

</mosaic_0001>

<bundles_post_ra>
// kernel: multi_head_attention.3
= control target key start
LH: loop header
LB: loop body
LE: loop exit
PB: predicated region body
PF: predicated region fallthrough
CT: control target
= control target key end

     0   :  { %s823_s12 = smov 0   ;;  %s825_s13 = smov 0   ;;  %s898_s0 = inlined_call_operand.vmem [shape: f32[2,4,8,8], index: 0, kind: input, shape index: {}]   ;;  %s899_s1 = inlined_call_operand.vmem [shape: f32[2,4,8,8], index: 1, kind: input, shape index: {}]   ;;  %s900_s2 = inlined_call_operand.vmem [shape: f32[2,4,8,8], index: 2, kind: input, shape index: {}]   ;;  %s901_s3 = inlined_call_operand.vmem [shape: f32[2,4,8,8], index: 3, kind: output, shape index: {}]  }
   0x1   :  { %s827_s14 = smov 0   ;;  %s829_s15 = smov 0  }
   0x2   :  { %s831_s16 = smov 0  }
   0x3 LB: > { %s35_s17 = sadd.s32 1, %s789_s14  ;;  %s39_s18 = sadd.s32 1, %s793_s15  ;;  %s797_s16 = sphi %s831_s16, %s13_s16   ;;  %s793_s15 = sphi %s829_s15, %s905_s15   ;;  %s789_s14 = sphi %s827_s14, %s904_s14   ;;  %s785_s13 = sphi %s825_s13, %s903_s13   ;;  %s781_s12 = sphi %s823_s12, %s902_s12  }
   0x4   : > { %p37_p0 = scmp.ge.s32.totalorder %s35_s17, 4  ;;  %p679_p1 = scmp.ge.s32.totalorder %s797_s16, 1 }
   0x5   : > { %p217_p2 = scmp.lt.s32.totalorder %s797_s16, 9 }
   0x6   : > { %s907_s17 = smov (%p37_p0, %s35_s17), 0  ;;  %s909_s18 = smov (!%p37_p0, %s39_s18), %s793_s15 }
   0x7   : > { %p218_p3 = pnand %p679_p1, %p217_p2  ;;  %p41_p4 = scmp.ge.s32.totalorder %s909_s18, 2 }
   0x8   : > { %p275_p5 = scmp.lt.s32.totalorder (!%p218_p3), %s785_s13, 1  ;;  %p277_p6 = scmp.lt.s32.totalorder (!%p218_p3), %s781_s12, 3 }
   0x9   : > { %s911_s18 = smov (%p41_p4, %s909_s18), 0  ;;  %221 = sbr.rel (%p218_p3) target bundleno = 789 (0x315), region = 32 }
   0xe   : > { %vm326_vm0 = vcmask 64512   ;;  %v799_v0 = vmov 0.0   ;;  %vm800_vm1 = vmmov 0   ;;  %s913_s13 = smov (!%p275_p5, %s785_s13), 1  ;;  %s915_s12 = smov (!%p277_p6, %s781_s12), 3  ;;  %vm323_vm2 = vcmask 7168  }
   0xf   : > { %697 = vmatprep.subr.mxu0 %v799_v0  ;;  %327 = vst.msk [vmem:[#allocation4] sm:$0xff] %vm326_vm0, %v799_v0  ;;  %699 = vmatprep.mubr.msk.f32.mxu0 %vm800_vm1, %v799_v0  ;;  %s680_s19 = sshll.u32 %s913_s13, 2  ;;  %v801_v3 = vmov -inf   ;;  %v802_v7 = vmov 0  }
  0x10   : > { %702 = vmatprep.subr.mxu1 %v799_v0  ;;  %704 = vmatprep.mubr.msk.f32.mxu1 %vm800_vm1, %v799_v0  ;;  %s283_s20 = sadd.s32 %s680_s19, %s915_s12  ;;  %324 = vst.msk [vmem:[#allocation2] sm:$0xff] %vm323_vm2, %v801_v3  ;;  %325 = vst.msk [vmem:[#allocation3] sm:$0xff] %vm323_vm2, %v799_v0 }
  0x11   : > { %s854_s21 = sshll.u32 %s283_s20, 3  ;;  %751 = vset.pattern.permute.xlu0 %v802_v7  ;;  %752 = vset.pattern.permute.xlu1 %v802_v7 }
  0x12   : > { %s296_s24 = scalar_lea.vmem %s899_s1, %s854_s21  ;;  %s285_s27 = scalar_lea.vmem %s898_s0, %s854_s21 }
  0x13   : > { %v329_v1 = vld [vmem:[%s296_s24] sm:$0xff]  ;;  %s307_s30 = scalar_lea.vmem %s900_s2, %s854_s21  ;;  %s318_s6 = scalar_lea.vmem %s901_s3, %s854_s21 }
  0x14   : > { %698 = vmatpush3.xpose.msk.msra.mxu0 %vm326_vm0, %v329_v1  ;;  %v328_v2 = vld [vmem:[%s285_s27] sm:$0xff] }
  0x15   : > { %v330_v12 = vld [vmem:[%s307_s30] sm:$0xff] }
  0x16   : > { %703 = vmatpush3.msra.mxu1 %v330_v12  ;;  %v432_v26 = vld [vmem:[#allocation4] sm:$0xff] }
  0x17   : > { %700 = vmatmul.mubr.msk.f32.vlgmr.msra.gmra.mxu0 %vm326_vm0, %v328_v2  ;;  %v408_v8 = vld [vmem:[#allocation2] sm:$0xff]  ;;  %v424_v20 = vld [vmem:[#allocation3] sm:$0xff] }
  0xd7   : > { %v404_v4 = vpop.f32.mrf.mxu0 }
  0xd8   : > { %v409_v5 = vsel %vm326_vm0, %v404_v4, -inf }
  0xd9   : > { %410 = vmax.xlane.f32.xlu0 %v409_v5  ;;  %v701_v6 = vpop.f32.mrf.mxu0 }
 0x162   : > { %v411_v9 = vpop.xlane.xlu0 %410 }
 0x163   : > { %v412_v10 = vmax.f32 %v408_v8, %v411_v9 }
 0x165   : > { %v413_v11 = vsub.f32 %v408_v8, %v412_v10  ;;  %514 = vst.msk [vmem:[#allocation2] sm:$0xff] %vm323_vm2, %v412_v10  ;;  %418 = vperm.xlu0 %751, %v412_v10  }
 0x167   : > { %v414_v17 = vmul.f32 1.442695, %v413_v11 }
 0x1e0   : > { %v419_v13 = vpop.permute.xlu0 %418 }
 0x1e1   : > { %v421_v14 = vsub.f32 %v404_v4, %v419_v13 }
 0x1e3   : > { %v422_v15 = vmul.f32 1.442695, %v421_v14 }
 0x1e5   : > { %753 = vpow2.f32 %v422_v15 }
 0x1e6   : > { %755 = vpow2.f32 %v414_v17 }
 0x1f2   : > { %v754_v16 = vpop.eup %753 }
 0x1f3   : > { %705 = vmatmul.mubr.msk.f32.vlgmr.msra.gmra.mxu1 %vm326_vm0, %v754_v16  ;;  %v426_v18 = vsel %vm326_vm0, %v754_v16, 0.0  ;;  %v756_v19 = vpop.eup %755 }
 0x1f4   : > { %427 = vadd.xlane.f32.xlu1 %v426_v18  ;;  %v425_v21 = vmul.f32 %v756_v19, %v424_v20 }
 0x205   : > { %435 = vperm.xlu1 %752, %v756_v19  }
 0x27d   : > { %v428_v22 = vpop.xlane.xlu1 %427 }
 0x27e   : > { %v429_v23 = vadd.f32 %v428_v22, %v425_v21 }
 0x280   : > { %431 = vst.msk [vmem:[#allocation3] sm:$0xff] %vm323_vm2, %v429_v23 }
 0x281   : > { %v436_v27 = vpop.permute.xlu1 %435 }
 0x282   : > { %v438_v28 = vmul.f32 %v436_v27, %v432_v26 }
 0x287   : > { %v518_v24 = vld [vmem:[#allocation3] sm:$0xff] }
 0x288   : > { %757 = vrcp.f32 %v518_v24 }
 0x295   : > { %v758_v25 = vpop.eup %757 }
 0x296   : > { %523 = vperm.xlu1 %752, %v758_v25  }
 0x2b3   : > { %v508_v29 = vpop.f32.mrf.mxu1 }
 0x2b4   : > { %v512_v30 = vadd.f32 %v508_v29, %v438_v28 }
 0x2b5   : > { %v706_v31 = vpop.f32.mrf.mxu1 }
 0x2b6   : > { %513 = vst.msk [vmem:[#allocation4] sm:$0xff] %vm326_vm0, %v512_v30 }
 0x2bd   : > { %v520_v32 = vld [vmem:[#allocation4] sm:$0xff] }
 0x311   : > { %v524_v33 = vpop.permute.xlu1 %523 }
 0x312   : > { %v526_v34 = vmul.f32 %v524_v33, %v520_v32 }
 0x314   : > { %527 = vst.msk [vmem:[%s318_s6] sm:$0xff] %vm326_vm0, %v526_v34 }
 0x315 PF: > { %s13_s16 = sadd.s32 1, %s797_s16   ;;  %s902_s12 = smov %s789_s14 }
 0x316   : > { %p10_p7 = scmp.ge.s32.totalorder %s13_s16, 10   ;;  %s903_s13 = smov %s793_s15 }
 0x317   : > { %s904_s14 = smov %s907_s17  ;;  %s905_s15 = smov %s911_s18 }
 0x318   :  { %12 = sbr.rel (!%p10_p7) target bundleno = 3 (0x3), region = 76 }

// kernel: multi_head_attention.2
= control target key start
LH: loop header
LB: loop body
LE: loop exit
PB: predicated region body
PF: predicated region fallthrough
CT: control target
= control target key end

     0   :  { %s1010_s15 = smov 0   ;;  %s1012_s16 = smov 0   ;;  %s1116_s0 = inlined_call_operand.vmem [shape: f32[2,8,32], index: 0, kind: input, shape index: {}]   ;;  %s1117_s1 = inlined_call_operand.vmem [shape: f32[3,4,8,32], index: 1, kind: input, shape index: {}]   ;;  %s1118_s2 = inlined_call_operand.vmem [shape: f32[2,4,8,8], index: 2, kind: output, shape index: {0}]   ;;  %s1119_s3 = inlined_call_operand.vmem [shape: f32[2,4,8,8], index: 3, kind: output, shape index: {1}]   ;;  %s1120_s4 = inlined_call_operand.vmem [shape: f32[2,4,8,8], index: 4, kind: output, shape index: {2}]  }
   0x1   :  { %s1014_s17 = smov 0   ;;  %s1016_s18 = smov 0  }
   0x2   :  { %s1018_s19 = smov 0   ;;  %s1020_s20 = smov 0  }
   0x3   :  { %s1022_s21 = smov 0  }
   0x4 LB: > { %s30_s22 = sadd.s32 1, %s973_s19  ;;  %s34_s23 = sadd.s32 1, %s977_s20  ;;  %s981_s21 = sphi %s1022_s21, %s15_s21   ;;  %s977_s20 = sphi %s1020_s20, %s1126_s20   ;;  %s973_s19 = sphi %s1018_s19, %s1125_s19   ;;  %s969_s18 = sphi %s1016_s18, %s1124_s18   ;;  %s965_s17 = sphi %s1014_s17, %s1123_s17   ;;  %s961_s16 = sphi %s1012_s16, %s1122_s16   ;;  %s957_s15 = sphi %s1010_s15, %s1121_s15  }
   0x5   : > { %p32_p0 = scmp.ge.s32.totalorder %s30_s22, 4  ;;  %s69_s24 = sadd.s32 1, %s961_s16 }
   0x6   : > { %p76_p1 = scmp.ne.s32.totalorder %s961_s16, %s957_s15  ;;  %p77_p2 = scmp.eq.s32.totalorder %s981_s21, 0 }
   0x7   : > { %s1128_s22 = smov (%p32_p0, %s30_s22), 0  ;;  %s1130_s23 = smov (!%p32_p0, %s34_s23), %s977_s20 }
   0x8   : > { %s66_s25 = ssub.s32 %s973_s19, %s1128_s22  ;;  %p78_p3 = por %p77_p2, %p76_p1 }
   0x9   : > { %p36_p4 = scmp.ge.s32.totalorder %s1130_s23, 2  ;;  %p67_p5 = scmp.eq.s32.totalorder %s66_s25, 0 }
   0xa   : > { %p826_p6 = scmp.ge.s32.totalorder %s981_s21, 8 }
   0xb   : > { %s1132_s23 = smov (%p36_p4, %s1130_s23), 0 }
   0xc   : > { %s1059_s26 = scalar_select %p67_p5, %s961_s16, %s69_s24  }
   0xd   : > { %192 = sbr.rel (%p826_p6) target bundleno = 25 (0x19), region = 16 }
  0x12   : > { %205 = sbr.rel (!%p78_p3) target bundleno = 25 (0x19), region = 24  ;;  %s207_s27 = sand.u32 (%p78_p3), 1, %s961_s16  }
  0x13   : > { %s827_s28 = sshll.u32 (%p78_p3), %s973_s19, 3  ;;  %s867_s29 = smul.u32 (%p78_p3), 24, %s207_s27 }
  0x14   : > { %s211_s6 = scalar_lea.vmem (%p78_p3), %s1117_s1, %s827_s28 }
  0x15   : > { %v244_v0 = vld [vmem:[%s211_s6] sm:$0xff] (%p78_p3)  ;;  %s209_s7 = scalar_lea.vmem (%p78_p3), [#allocation2], %s867_s29 }
  0x16   : > { %v246_v1 = vld [vmem:[%s211_s6 + $0x20] sm:$0xff] (%p78_p3)  ;;  %245 = vst [vmem:[%s209_s7] sm:$0xff] (%p78_p3), %v244_v0 }
  0x17   : > { %v248_v2 = vld [vmem:[%s211_s6 + $0x40] sm:$0xff]  ;;  %247 = vst [vmem:[%s209_s7 + $0x8] sm:$0xff] %v246_v1 }
  0x18   : > { %249 = vst [vmem:[%s209_s7 + $0x10] sm:$0xff] %v248_v2 }
  0x19 PF: > { %p828_p7 = scmp.ge.s32.totalorder %s981_s21, 1  ;;  %p254_p8 = scmp.lt.s32.totalorder %s981_s21, 9 }
  0x1b   : > { %p255_p9 = pnand %p828_p7, %p254_p8 }
  0x1c   : > { %s261_s8 = sand.u32 (!%p255_p9), 1, %s957_s15   ;;  %p321_p10 = scmp.lt.s32.totalorder (!%p255_p9), %s969_s18, 1 }
  0x1d   : > { %258 = sbr.rel (%p255_p9) target bundleno = 239 (0xef), region = 62  ;;  %p330_p11 = scmp.lt.s32.totalorder (!%p255_p9), %s965_s17, 3 }
  0x1e   : > { %s868_s9 = smul.u32 (!%p255_p9), 24, %s261_s8 }
  0x20   : > { %s263_s10 = scalar_lea.vmem (!%p255_p9), [#allocation2], %s868_s9 }
  0x22   : > { %v983_v3 = vmov 0.0   ;;  %vm984_vm0 = vmmov 0   ;;  %vm363_vm1 = vcmask 261120   ;;  %s1134_s18 = smov (!%p321_p10, %s969_s18), 1  ;;  %v362_v4 = vld [vmem:[%s263_s10] sm:$0xff]  ;;  %v838_v5 = vld [vmem:[%s263_s10 + $0x8] sm:$0xff] }
  0x23   : > { %852 = vmatprep.subr.mxu0 %v983_v3  ;;  %854 = vmatprep.mubr.msk.f32.mxu0 %vm984_vm0, %v983_v3  ;;  %s829_s11 = sshll.u32 %s1134_s18, 3  ;;  %v841_v7 = vld [vmem:[%s263_s10 + $0x10] sm:$0xff]  ;;  %s1136_s17 = smov (!%p330_p11, %s965_s17), 3  ;;  %vm591_vm2 = vcmask 64512  }
  0x24   : > { %857 = vmatprep.subr.mxu1 %v983_v3  ;;  %859 = vmatprep.mubr.msk.f32.mxu1 %vm984_vm0, %v983_v3  ;;  %s327_s14 = scalar_lea.vmem %s1116_s0, %s829_s11  ;;  %s830_s15 = sshll.u32 %s1134_s18, 2 }
  0x25   : > { %853 = vmatpush3.xpose.msk.msra.mxu0 %vm363_vm1, %v362_v4  ;;  %858 = vmatpush3.xpose.msk.msra.mxu1 %vm363_vm1, %v838_v5  ;;  %v361_v6 = vld [vmem:[%s327_s14] sm:$0xff]  ;;  %s336_s24 = sadd.s32 %s830_s15, %s1136_s17 }
  0x26   : > { %862 = vmatprep.subr.mxu0 %v983_v3  ;;  %s831_s25 = sshll.u32 %s336_s24, 3 }
  0x27   : > { %s349_s29 = scalar_lea.vmem %s1119_s3, %s831_s25  ;;  %s338_s6 = scalar_lea.vmem %s1118_s2, %s831_s25 }
  0x28   : > { %855 = vmatmul.mubr.msk.f32.vlgmr.msra.gmra.mxu0 %vm363_vm1, %v361_v6  ;;  %860 = vmatmul.mubr.msk.f32.vlgmr.msra.gmra.mxu1 %vm363_vm1, %v361_v6  ;;  %s360_s18 = scalar_lea.vmem %s1120_s4, %s831_s25 }
  0x29   : > { %863 = vmatpush3.xpose.msk.msra.mxu0 %vm363_vm1, %v841_v7  ;;  %864 = vmatprep.mubr.msk.f32.mxu0 %vm984_vm0, %v983_v3 }
  0x2c   : > { %865 = vmatmul.mubr.msk.f32.vlgmr.msra.gmra.mxu0 %vm363_vm1, %v361_v6 }
  0xe8   : > { %v436_v8 = vpop.f32.mrf.mxu0  ;;  %v511_v9 = vpop.f32.mrf.mxu1 }
  0xe9   : > { %v590_v10 = vmul.f32 0.17677669, %v436_v8  ;;  %593 = vst.msk [vmem:[%s349_s29] sm:$0xff] %vm591_vm2, %v511_v9 }
  0xea   : > { %v856_v11 = vpop.f32.mrf.mxu0  ;;  %v861_v12 = vpop.f32.mrf.mxu1 }
  0xeb   : > { %592 = vst.msk [vmem:[%s338_s6] sm:$0xff] %vm591_vm2, %v590_v10 }
  0xec   : > { %v586_v13 = vpop.f32.mrf.mxu0 }
  0xed   : > { %594 = vst.msk [vmem:[%s360_s18] sm:$0xff] %vm591_vm2, %v586_v13 }
  0xee   : > { %v866_v14 = vpop.f32.mrf.mxu0 }
  0xef PF: > { %s15_s21 = sadd.s32 1, %s981_s21   ;;  %s1121_s15 = smov %s961_s16 }
  0xf0   : > { %p12_p12 = scmp.ge.s32.totalorder %s15_s21, 10   ;;  %s1122_s16 = smov %s1059_s26 }
  0xf1   : > { %s1123_s17 = smov %s973_s19  ;;  %s1124_s18 = smov %s977_s20 }
  0xf2   : > { %s1125_s19 = smov %s1128_s22  ;;  %s1126_s20 = smov %s1132_s23 }
  0xf3   :  { %14 = sbr.rel (!%p12_p12) target bundleno = 4 (0x4), region = 130 }

</bundles_post_ra>
